<compile_context>
chip_gen: v5e
topology: v5e:2x2
jax: 0.10.0
libtpu: 0.0.40
codegen_flags: <defaults>
</compile_context>

<pallas_src>
import functools
import numpy as np
import jax
import jax.numpy as jnp
from jax import lax
from jax.experimental import pallas as pl
from jax.experimental.pallas import tpu as pltpu

LANES = 128


def _layer_norm(v, w, b, eps=1e-6):
    mu = jnp.mean(v, axis=-1, keepdims=True)
    var = jnp.mean((v - mu) ** 2, axis=-1, keepdims=True)
    return (v - mu) * lax.rsqrt(var + eps) * w + b


def asset_encoder_kernel(
    x_ref,      # [BS, F]     batch-flattened input
    wd_ref,     # [F, E]      daily_embedding weight (pre-transposed [in,out])
    wqkv_ref,   # [E, 3E]     MHA in_proj weight, Q columns pre-scaled by 1/sqrt(Dh)
    wo_ref,     # [E, E]      MHA out_proj weight
    w1_ref,     # [E, 2E]     FFN layer 1
    w2_ref,     # [2E, E]     FFN layer 2
    wp_ref,     # [E, 128]    projection weight, lane-padded to 128
    sp_ref,     # [R, 128]    packed slab: pe+bd rows, mask, pool, broadcast params
    out_ref,    # [B_pad, 128] lane/sublane-padded output
    *, B, S, E, num_heads, B_pad, offs,
):
    f32 = jnp.float32
    BS = B * S
    H = num_heads
    Dh = E // H

    # ---- unpack the packed slab (all static, 8-row-aligned slices) ----
    def prow(name, width):
        r = offs[name]
        return sp_ref[r:r + 1, 0:width]

    pe_bd = sp_ref[offs["pe_bd"]:offs["pe_bd"] + BS, 0:E]      # pos-enc + embed bias
    mask  = sp_ref[offs["mask"]:offs["mask"] + BS, 0:BS]       # additive 0 / -1e30
    pool  = sp_ref[offs["pool"]:offs["pool"] + B_pad, 0:BS]    # mean-pool matrix
    bqkv = prow("bqkv", 3 * E)
    bo   = prow("bo", E)
    ln1w = prow("ln1w", E); ln1b = prow("ln1b", E)
    ln2w = prow("ln2w", E); ln2b = prow("ln2b", E)
    b1   = prow("b1", 2 * E)
    b2   = prow("b2", E)
    bp   = prow("bp", LANES)                                   # lane-padded to 128

    x = x_ref[...]                                             # [BS, F]

    # ---- daily_embedding + positional encoding (embed bias folded into pe_bd) ----
    h = jnp.dot(x, wd_ref[...], preferred_element_type=f32) + pe_bd        # [BS, E]

    # ---- pre-norm transformer block: multi-head self-attention ----
    n1 = _layer_norm(h, ln1w, ln1b)
    qkv = jnp.dot(n1, wqkv_ref[...], preferred_element_type=f32) + bqkv    # [BS, 3E]

    # heads as an unrolled loop; concat folded into out-projection accumulation
    attn = jnp.zeros((BS, E), f32)
    for hd in range(H):
        q = qkv[:, hd * Dh:(hd + 1) * Dh]                 # [BS, Dh]  (Q pre-scaled)
        k = qkv[:, E + hd * Dh:E + (hd + 1) * Dh]
        v = qkv[:, 2 * E + hd * Dh:2 * E + (hd + 1) * Dh]
        # scores with rhs-transposed contraction (no materialized transpose)
        s = lax.dot_general(q, k, (((1,), (1,)), ((), ())),
                            preferred_element_type=f32) + mask             # [BS, BS]
        m = jnp.max(s, axis=-1, keepdims=True)
        p = jnp.exp(s - m)
        denom = jnp.sum(p, axis=-1, keepdims=True)
        o = jnp.dot(p, v, preferred_element_type=f32)                      # [BS, Dh]
        o = o * pl.reciprocal(denom)          # exact; normalize after PV matmul
        attn = attn + jnp.dot(o, wo_ref[hd * Dh:(hd + 1) * Dh, :],
                              preferred_element_type=f32)
    h = h + attn + bo                          # dropout = identity (eval)

    # ---- FFN ----
    n2 = _layer_norm(h, ln2w, ln2b)
    ff = jnp.dot(n2, w1_ref[...], preferred_element_type=f32) + b1
    ff = jnp.maximum(ff, 0.0)
    ff = jnp.dot(ff, w2_ref[...], preferred_element_type=f32) + b2
    h = h + ff                                 # dropout = identity (eval)

    # ---- mean pool over seq (precomputed pool matrix, MXU) + projection ----
    pooled = jnp.dot(pool, h, preferred_element_type=f32)                  # [B_pad, E]
    out_ref[...] = jnp.dot(pooled, wp_ref[...], preferred_element_type=f32) + bp


def make_positional_encoding(seq_len, embed_dim):
    position = np.arange(seq_len, dtype=np.float32)[:, None]
    div_term = np.exp(np.arange(0, embed_dim, 2, dtype=np.float32)
                      * (-np.log(10000.0) / embed_dim))
    pe = np.zeros((seq_len, embed_dim), dtype=np.float32)
    pe[:, 0::2] = np.sin(position * div_term)
    pe[:, 1::2] = np.cos(position * div_term)
    return jnp.asarray(pe)


def init_params(key, feature_dim, embed_dim):
    ks = jax.random.split(key, 8)
    s = 0.05
    p = {
        # stored already transposed to [in, out]
        "wd":   jax.random.normal(ks[0], (feature_dim, embed_dim), jnp.float32) * s,
        "bd":   jnp.zeros((1, embed_dim), jnp.float32),
        "ln1w": jnp.ones((1, embed_dim), jnp.float32),
        "ln1b": jnp.zeros((1, embed_dim), jnp.float32),
        "wqkv": jax.random.normal(ks[1], (embed_dim, 3 * embed_dim), jnp.float32) * s,
        "bqkv": jnp.zeros((1, 3 * embed_dim), jnp.float32),
        "wo":   jax.random.normal(ks[2], (embed_dim, embed_dim), jnp.float32) * s,
        "bo":   jnp.zeros((1, embed_dim), jnp.float32),
        "ln2w": jnp.ones((1, embed_dim), jnp.float32),
        "ln2b": jnp.zeros((1, embed_dim), jnp.float32),
        "w1":   jax.random.normal(ks[3], (embed_dim, 2 * embed_dim), jnp.float32) * s,
        "b1":   jax.random.normal(ks[4], (1, 2 * embed_dim), jnp.float32) * s,
        "w2":   jax.random.normal(ks[5], (2 * embed_dim, embed_dim), jnp.float32) * s,
        "b2":   jnp.zeros((1, embed_dim), jnp.float32),
        "wp":   jax.random.normal(ks[6], (embed_dim, embed_dim), jnp.float32) * s,
        "bp":   jax.random.normal(ks[7], (1, embed_dim), jnp.float32) * s,
    }
    return p


def _pad_lanes(a, width=LANES):
    return jnp.pad(a, ((0, 0), (0, width - a.shape[-1])))


def asset_encoder_forward(daily_data, params, pe, num_heads):
    B, S, F = daily_data.shape
    E = params["wd"].shape[1]
    BS = B * S
    Dh = E // num_heads
    assert E % num_heads == 0
    assert 3 * E <= LANES, "packed-param slab assumes 3*E <= 128 lanes"
    assert BS <= LANES, "precomputed mask/pool assume B*S <= 128 lanes (toy config)"
    B_pad = -(-B // 8) * 8

    # fold the 1/sqrt(Dh) attention scale into the Q columns of in_proj (w + b)
    scale = 1.0 / float(np.sqrt(Dh))
    q_scale = jnp.concatenate(
        [jnp.full((E,), scale, jnp.float32), jnp.ones((2 * E,), jnp.float32)])
    wqkv = params["wqkv"] * q_scale[None, :]
    bqkv = params["bqkv"] * q_scale[None, :]

    # positional encoding tiled over batch, embed bias folded in
    pe_bd = jnp.tile(pe, (B, 1)) + params["bd"]                  # [BS, E]

    # host-precomputed block-diagonal additive mask and mean-pool matrix
    bidx = np.repeat(np.arange(B), S)
    mask_np = np.where(bidx[:, None] == bidx[None, :], 0.0, -1e30).astype(np.float32)
    pool_np = np.zeros((B_pad, BS), np.float32)
    for b in range(B):
        pool_np[b, b * S:(b + 1) * S] = 1.0 / S
    mask = jnp.asarray(mask_np)
    pool = jnp.asarray(pool_np)

    # ---- pack everything small into ONE lane-padded, sublane-aligned slab ----
    def pad_block(a):
        rpad = (-a.shape[0]) % 8
        return jnp.pad(a, ((0, rpad), (0, LANES - a.shape[1])))

    sections, offsets = [], {}
    row = 0
    def add(name, a):
        nonlocal row
        blk = pad_block(a)
        offsets[name] = row
        sections.append(blk)
        row += blk.shape[0]

    add("pe_bd", pe_bd)
    add("mask", mask)
    add("pool", pool)
    for name, val in [("bqkv", bqkv), ("bo", params["bo"]),
                      ("ln1w", params["ln1w"]), ("ln1b", params["ln1b"]),
                      ("ln2w", params["ln2w"]), ("ln2b", params["ln2b"]),
                      ("b1", params["b1"]), ("b2", params["b2"]),
                      ("bp", params["bp"])]:
        add(name, val)                        # each 1 row -> its own 8-row block
    sp = jnp.concatenate(sections, axis=0)    # [R, 128], one DMA

    wp_pad = _pad_lanes(params["wp"])         # [E, 128] lane-dense output path
    x2 = daily_data.reshape(BS, F)            # batch-flattened

    kernel = functools.partial(asset_encoder_kernel, B=B, S=S, E=E,
                               num_heads=num_heads, B_pad=B_pad, offs=offsets)

    def fullspec(a):
        nd = a.ndim
        return pl.BlockSpec(a.shape, lambda i, _nd=nd: (0,) * _nd)

    inputs = (x2, params["wd"], wqkv, params["wo"], params["w1"],
              params["w2"], wp_pad, sp)

    out = pl.pallas_call(
        kernel,
        out_shape=jax.ShapeDtypeStruct((B_pad, LANES), jnp.float32),
        grid=(1,),                            # single fused step for the toy shape
        in_specs=[fullspec(a) for a in inputs],
        out_specs=pl.BlockSpec((B_pad, LANES), lambda i: (0, 0)),
        compiler_params=pltpu.CompilerParams(
            dimension_semantics=("arbitrary",)),
    )(*inputs)
    return out[:B, :E]                        # strip sublane + lane padding


def asset_encoder_reference(daily_data, params, pe, num_heads):
    """Pure-JAX reference mirroring the PyTorch forward (eval mode)."""
    h = daily_data @ params["wd"] + params["bd"]
    h = h + pe[None]
    n1 = _layer_norm(h, params["ln1w"], params["ln1b"])
    qkv = n1 @ params["wqkv"] + params["bqkv"]
    E = h.shape[-1]
    q, k, v = qkv[..., :E], qkv[..., E:2 * E], qkv[..., 2 * E:]
    B, S, _ = h.shape
    d_head = E // num_heads

    def split(t):
        return t.reshape(B, S, num_heads, d_head).transpose(0, 2, 1, 3)
    qh, kh, vh = split(q), split(k), split(v)
    s = jnp.einsum("bhqd,bhkd->bhqk", qh, kh) / np.sqrt(d_head)
    p = jax.nn.softmax(s, axis=-1)
    attn = jnp.einsum("bhqk,bhkd->bhqd", p, vh).transpose(0, 2, 1, 3).reshape(B, S, E)
    attn = attn @ params["wo"] + params["bo"]
    h = h + attn
    n2 = _layer_norm(h, params["ln2w"], params["ln2b"])
    ff = jnp.maximum(n2 @ params["w1"] + params["b1"], 0.0) @ params["w2"] + params["b2"]
    h = h + ff
    pooled = jnp.mean(h, axis=1)
    return pooled @ params["wp"] + params["bp"]


if __name__ == "__main__":
    B, S, F, E, H = 2, 8, 16, 32, 4   # batch, daily_seq_len, feature_dim, embed_dim, heads

    key = jax.random.PRNGKey(0)
    k_data, k_param = jax.random.split(key)
    daily_data = jax.random.normal(k_data, (B, S, F), jnp.float32)
    params = init_params(k_param, F, E)
    pe = make_positional_encoding(S, E)

    out = asset_encoder_forward(daily_data, params, pe, H)
    jax.block_until_ready(out)

    ref = asset_encoder_reference(daily_data, params, pe, H)
    # tolerance absorbs f32 accumulation-order / MXU precision differences
    # (softmax reciprocal is exact in this version).
    np.testing.assert_allclose(np.asarray(out), np.asarray(ref), rtol=2e-3, atol=2e-4)
    assert out.shape == (B, E)

    print("KERNEL_OK")
</pallas_src>

<mosaic_0001>
module attributes {stable_mosaic.version = 11 : i64} {
  func.func @asset_encoder_kernel(%arg0: i32, %arg1: memref<16x16xf32, #tpu.memory_space<vmem>>, %arg2: memref<16x32xf32, #tpu.memory_space<vmem>>, %arg3: memref<32x96xf32, #tpu.memory_space<vmem>>, %arg4: memref<32x32xf32, #tpu.memory_space<vmem>>, %arg5: memref<32x64xf32, #tpu.memory_space<vmem>>, %arg6: memref<64x32xf32, #tpu.memory_space<vmem>>, %arg7: memref<32x128xf32, #tpu.memory_space<vmem>>, %arg8: memref<112x128xf32, #tpu.memory_space<vmem>>, %arg9: memref<8x128xf32, #tpu.memory_space<vmem>>) attributes {dimension_semantics = [#tpu.dimension_semantics<arbitrary>], iteration_bounds = array<i64: 1>, scalar_prefetch = 0 : i64, scratch_operands = 0 : i64, tpu.core_type = #tpu.core_type<tc>, window_params = [{pipeline_mode = #tpu.pipeline_mode<synchronous>, transform_indices = @transform_0, window_bounds = array<i64: 16, 16>}, {pipeline_mode = #tpu.pipeline_mode<synchronous>, transform_indices = @transform_1, window_bounds = array<i64: 16, 32>}, {pipeline_mode = #tpu.pipeline_mode<synchronous>, transform_indices = @transform_2, window_bounds = array<i64: 32, 96>}, {pipeline_mode = #tpu.pipeline_mode<synchronous>, transform_indices = @transform_3, window_bounds = array<i64: 32, 32>}, {pipeline_mode = #tpu.pipeline_mode<synchronous>, transform_indices = @transform_4, window_bounds = array<i64: 32, 64>}, {pipeline_mode = #tpu.pipeline_mode<synchronous>, transform_indices = @transform_5, window_bounds = array<i64: 64, 32>}, {pipeline_mode = #tpu.pipeline_mode<synchronous>, transform_indices = @transform_6, window_bounds = array<i64: 32, 128>}, {pipeline_mode = #tpu.pipeline_mode<synchronous>, transform_indices = @transform_7, window_bounds = array<i64: 112, 128>}, {pipeline_mode = #tpu.pipeline_mode<synchronous>, transform_indices = @transform_8, window_bounds = array<i64: 8, 128>}]} {
    %c0 = arith.constant 0 : index
    %c0_0 = arith.constant 0 : index
    %0 = vector.load %arg8[%c0, %c0_0] : memref<112x128xf32, #tpu.memory_space<vmem>>, vector<16x32xf32>
    %c16 = arith.constant 16 : index
    %c0_1 = arith.constant 0 : index
    %1 = vector.load %arg8[%c16, %c0_1] : memref<112x128xf32, #tpu.memory_space<vmem>>, vector<16x16xf32>
    %c32 = arith.constant 32 : index
    %c0_2 = arith.constant 0 : index
    %2 = vector.load %arg8[%c32, %c0_2] : memref<112x128xf32, #tpu.memory_space<vmem>>, vector<8x16xf32>
    %c40 = arith.constant 40 : index
    %c0_3 = arith.constant 0 : index
    %3 = vector.load %arg8[%c40, %c0_3] : memref<112x128xf32, #tpu.memory_space<vmem>>, vector<1x96xf32>
    %c48 = arith.constant 48 : index
    %c0_4 = arith.constant 0 : index
    %4 = vector.load %arg8[%c48, %c0_4] : memref<112x128xf32, #tpu.memory_space<vmem>>, vector<1x32xf32>
    %c56 = arith.constant 56 : index
    %c0_5 = arith.constant 0 : index
    %5 = vector.load %arg8[%c56, %c0_5] : memref<112x128xf32, #tpu.memory_space<vmem>>, vector<1x32xf32>
    %c64 = arith.constant 64 : index
    %c0_6 = arith.constant 0 : index
    %6 = vector.load %arg8[%c64, %c0_6] : memref<112x128xf32, #tpu.memory_space<vmem>>, vector<1x32xf32>
    %c72 = arith.constant 72 : index
    %c0_7 = arith.constant 0 : index
    %7 = vector.load %arg8[%c72, %c0_7] : memref<112x128xf32, #tpu.memory_space<vmem>>, vector<1x32xf32>
    %c80 = arith.constant 80 : index
    %c0_8 = arith.constant 0 : index
    %8 = vector.load %arg8[%c80, %c0_8] : memref<112x128xf32, #tpu.memory_space<vmem>>, vector<1x32xf32>
    %c88 = arith.constant 88 : index
    %c0_9 = arith.constant 0 : index
    %9 = vector.load %arg8[%c88, %c0_9] : memref<112x128xf32, #tpu.memory_space<vmem>>, vector<1x64xf32>
    %c96 = arith.constant 96 : index
    %c0_10 = arith.constant 0 : index
    %10 = vector.load %arg8[%c96, %c0_10] : memref<112x128xf32, #tpu.memory_space<vmem>>, vector<1x32xf32>
    %c104 = arith.constant 104 : index
    %c0_11 = arith.constant 0 : index
    %11 = vector.load %arg8[%c104, %c0_11] : memref<112x128xf32, #tpu.memory_space<vmem>>, vector<1x128xf32>
    %c0_12 = arith.constant 0 : index
    %c0_13 = arith.constant 0 : index
    %12 = vector.load %arg1[%c0_12, %c0_13] : memref<16x16xf32, #tpu.memory_space<vmem>>, vector<16x16xf32>
    %c0_14 = arith.constant 0 : index
    %c0_15 = arith.constant 0 : index
    %13 = vector.load %arg2[%c0_14, %c0_15] : memref<16x32xf32, #tpu.memory_space<vmem>>, vector<16x32xf32>
    %cst = arith.constant dense<0.000000e+00> : vector<16x32xf32>
    %14 = tpu.matmul %12, %13, %cst {dimension_numbers = #tpu.dot_dimension_numbers<[1], [0], [0], [1], [0, 0, 1, 1], [], []>} : vector<16x16xf32>, vector<16x32xf32>, vector<16x32xf32> -> vector<16x32xf32>
    %15 = arith.addf %14, %0 : vector<16x32xf32>
    %cst_16 = arith.constant dense<0.000000e+00> : vector<16xf32>
    %16 = vector.multi_reduction <add>, %15, %cst_16 [1] : vector<16x32xf32> to vector<16xf32>
    %17 = vector.shape_cast %16 : vector<16xf32> to vector<16x1xf32>
    %cst_17 = arith.constant 3.200000e+01 : f32
    %18 = vector.broadcast %cst_17 : f32 to vector<16x1xf32>
    %19 = arith.divf %17, %18 : vector<16x1xf32>
    %20 = vector.broadcast %19 : vector<16x1xf32> to vector<16x32xf32>
    %21 = arith.subf %15, %20 : vector<16x32xf32>
    %22 = arith.mulf %21, %21 : vector<16x32xf32>
    %cst_18 = arith.constant dense<0.000000e+00> : vector<16xf32>
    %23 = vector.multi_reduction <add>, %22, %cst_18 [1] : vector<16x32xf32> to vector<16xf32>
    %24 = vector.shape_cast %23 : vector<16xf32> to vector<16x1xf32>
    %cst_19 = arith.constant 3.200000e+01 : f32
    %25 = vector.broadcast %cst_19 : f32 to vector<16x1xf32>
    %26 = arith.divf %24, %25 : vector<16x1xf32>
    %27 = vector.broadcast %19 : vector<16x1xf32> to vector<16x32xf32>
    %28 = arith.subf %15, %27 : vector<16x32xf32>
    %cst_20 = arith.constant 9.99999997E-7 : f32
    %29 = vector.broadcast %cst_20 : f32 to vector<16x1xf32>
    %30 = arith.addf %26, %29 : vector<16x1xf32>
    %31 = math.rsqrt %30 : vector<16x1xf32>
    %32 = vector.broadcast %31 : vector<16x1xf32> to vector<16x32xf32>
    %33 = arith.mulf %28, %32 : vector<16x32xf32>
    %34 = vector.broadcast %5 : vector<1x32xf32> to vector<16x32xf32>
    %35 = arith.mulf %33, %34 : vector<16x32xf32>
    %36 = vector.broadcast %6 : vector<1x32xf32> to vector<16x32xf32>
    %37 = arith.addf %35, %36 : vector<16x32xf32>
    %c0_21 = arith.constant 0 : index
    %c0_22 = arith.constant 0 : index
    %38 = vector.load %arg3[%c0_21, %c0_22] : memref<32x96xf32, #tpu.memory_space<vmem>>, vector<32x96xf32>
    %cst_23 = arith.constant dense<0.000000e+00> : vector<16x96xf32>
    %39 = tpu.matmul %37, %38, %cst_23 {dimension_numbers = #tpu.dot_dimension_numbers<[1], [0], [0], [1], [0, 0, 1, 1], [], []>} : vector<16x32xf32>, vector<32x96xf32>, vector<16x96xf32> -> vector<16x96xf32>
    %40 = vector.broadcast %3 : vector<1x96xf32> to vector<16x96xf32>
    %41 = arith.addf %39, %40 : vector<16x96xf32>
    %cst_24 = arith.constant 0.000000e+00 : f32
    %42 = vector.broadcast %cst_24 : f32 to vector<16x32xf32>
    %43 = vector.extract_strided_slice %41 {offsets = [0, 0], sizes = [16, 8], strides = [1, 1]} : vector<16x96xf32> to vector<16x8xf32>
    %44 = vector.extract_strided_slice %41 {offsets = [0, 32], sizes = [16, 8], strides = [1, 1]} : vector<16x96xf32> to vector<16x8xf32>
    %45 = vector.extract_strided_slice %41 {offsets = [0, 64], sizes = [16, 8], strides = [1, 1]} : vector<16x96xf32> to vector<16x8xf32>
    %cst_25 = arith.constant dense<0.000000e+00> : vector<16x16xf32>
    %46 = tpu.matmul %43, %44, %cst_25 {dimension_numbers = #tpu.dot_dimension_numbers<[1], [1], [0], [0], [0, 0, 1, 0], [], []>} : vector<16x8xf32>, vector<16x8xf32>, vector<16x16xf32> -> vector<16x16xf32>
    %47 = arith.addf %46, %1 : vector<16x16xf32>
    %cst_26 = arith.constant dense<0xFF800000> : vector<16xf32>
    %48 = vector.multi_reduction <maximumf>, %47, %cst_26 [1] : vector<16x16xf32> to vector<16xf32>
    %49 = vector.shape_cast %48 : vector<16xf32> to vector<16x1xf32>
    %50 = vector.broadcast %49 : vector<16x1xf32> to vector<16x16xf32>
    %51 = arith.subf %47, %50 : vector<16x16xf32>
    %52 = math.exp %51 : vector<16x16xf32>
    %cst_27 = arith.constant dense<0.000000e+00> : vector<16xf32>
    %53 = vector.multi_reduction <add>, %52, %cst_27 [1] : vector<16x16xf32> to vector<16xf32>
    %54 = vector.shape_cast %53 : vector<16xf32> to vector<16x1xf32>
    %cst_28 = arith.constant dense<0.000000e+00> : vector<16x8xf32>
    %55 = tpu.matmul %52, %45, %cst_28 {dimension_numbers = #tpu.dot_dimension_numbers<[1], [0], [0], [1], [0, 0, 1, 1], [], []>} : vector<16x16xf32>, vector<16x8xf32>, vector<16x8xf32> -> vector<16x8xf32>
    %56 = tpu.reciprocal %54 : vector<16x1xf32> -> vector<16x1xf32>
    %57 = vector.broadcast %56 : vector<16x1xf32> to vector<16x8xf32>
    %58 = arith.mulf %55, %57 : vector<16x8xf32>
    %c0_29 = arith.constant 0 : index
    %c0_30 = arith.constant 0 : index
    %59 = vector.load %arg4[%c0_29, %c0_30] : memref<32x32xf32, #tpu.memory_space<vmem>>, vector<8x32xf32>
    %cst_31 = arith.constant dense<0.000000e+00> : vector<16x32xf32>
    %60 = tpu.matmul %58, %59, %cst_31 {dimension_numbers = #tpu.dot_dimension_numbers<[1], [0], [0], [1], [0, 0, 1, 1], [], []>} : vector<16x8xf32>, vector<8x32xf32>, vector<16x32xf32> -> vector<16x32xf32>
    %61 = arith.addf %42, %60 : vector<16x32xf32>
    %62 = vector.extract_strided_slice %41 {offsets = [0, 8], sizes = [16, 8], strides = [1, 1]} : vector<16x96xf32> to vector<16x8xf32>
    %63 = vector.extract_strided_slice %41 {offsets = [0, 40], sizes = [16, 8], strides = [1, 1]} : vector<16x96xf32> to vector<16x8xf32>
    %64 = vector.extract_strided_slice %41 {offsets = [0, 72], sizes = [16, 8], strides = [1, 1]} : vector<16x96xf32> to vector<16x8xf32>
    %cst_32 = arith.constant dense<0.000000e+00> : vector<16x16xf32>
    %65 = tpu.matmul %62, %63, %cst_32 {dimension_numbers = #tpu.dot_dimension_numbers<[1], [1], [0], [0], [0, 0, 1, 0], [], []>} : vector<16x8xf32>, vector<16x8xf32>, vector<16x16xf32> -> vector<16x16xf32>
    %66 = arith.addf %65, %1 : vector<16x16xf32>
    %cst_33 = arith.constant dense<0xFF800000> : vector<16xf32>
    %67 = vector.multi_reduction <maximumf>, %66, %cst_33 [1] : vector<16x16xf32> to vector<16xf32>
    %68 = vector.shape_cast %67 : vector<16xf32> to vector<16x1xf32>
    %69 = vector.broadcast %68 : vector<16x1xf32> to vector<16x16xf32>
    %70 = arith.subf %66, %69 : vector<16x16xf32>
    %71 = math.exp %70 : vector<16x16xf32>
    %cst_34 = arith.constant dense<0.000000e+00> : vector<16xf32>
    %72 = vector.multi_reduction <add>, %71, %cst_34 [1] : vector<16x16xf32> to vector<16xf32>
    %73 = vector.shape_cast %72 : vector<16xf32> to vector<16x1xf32>
    %cst_35 = arith.constant dense<0.000000e+00> : vector<16x8xf32>
    %74 = tpu.matmul %71, %64, %cst_35 {dimension_numbers = #tpu.dot_dimension_numbers<[1], [0], [0], [1], [0, 0, 1, 1], [], []>} : vector<16x16xf32>, vector<16x8xf32>, vector<16x8xf32> -> vector<16x8xf32>
    %75 = tpu.reciprocal %73 : vector<16x1xf32> -> vector<16x1xf32>
    %76 = vector.broadcast %75 : vector<16x1xf32> to vector<16x8xf32>
    %77 = arith.mulf %74, %76 : vector<16x8xf32>
    %c8 = arith.constant 8 : index
    %c0_36 = arith.constant 0 : index
    %78 = vector.load %arg4[%c8, %c0_36] : memref<32x32xf32, #tpu.memory_space<vmem>>, vector<8x32xf32>
    %cst_37 = arith.constant dense<0.000000e+00> : vector<16x32xf32>
    %79 = tpu.matmul %77, %78, %cst_37 {dimension_numbers = #tpu.dot_dimension_numbers<[1], [0], [0], [1], [0, 0, 1, 1], [], []>} : vector<16x8xf32>, vector<8x32xf32>, vector<16x32xf32> -> vector<16x32xf32>
    %80 = arith.addf %61, %79 : vector<16x32xf32>
    %81 = vector.extract_strided_slice %41 {offsets = [0, 16], sizes = [16, 8], strides = [1, 1]} : vector<16x96xf32> to vector<16x8xf32>
    %82 = vector.extract_strided_slice %41 {offsets = [0, 48], sizes = [16, 8], strides = [1, 1]} : vector<16x96xf32> to vector<16x8xf32>
    %83 = vector.extract_strided_slice %41 {offsets = [0, 80], sizes = [16, 8], strides = [1, 1]} : vector<16x96xf32> to vector<16x8xf32>
    %cst_38 = arith.constant dense<0.000000e+00> : vector<16x16xf32>
    %84 = tpu.matmul %81, %82, %cst_38 {dimension_numbers = #tpu.dot_dimension_numbers<[1], [1], [0], [0], [0, 0, 1, 0], [], []>} : vector<16x8xf32>, vector<16x8xf32>, vector<16x16xf32> -> vector<16x16xf32>
    %85 = arith.addf %84, %1 : vector<16x16xf32>
    %cst_39 = arith.constant dense<0xFF800000> : vector<16xf32>
    %86 = vector.multi_reduction <maximumf>, %85, %cst_39 [1] : vector<16x16xf32> to vector<16xf32>
    %87 = vector.shape_cast %86 : vector<16xf32> to vector<16x1xf32>
    %88 = vector.broadcast %87 : vector<16x1xf32> to vector<16x16xf32>
    %89 = arith.subf %85, %88 : vector<16x16xf32>
    %90 = math.exp %89 : vector<16x16xf32>
    %cst_40 = arith.constant dense<0.000000e+00> : vector<16xf32>
    %91 = vector.multi_reduction <add>, %90, %cst_40 [1] : vector<16x16xf32> to vector<16xf32>
    %92 = vector.shape_cast %91 : vector<16xf32> to vector<16x1xf32>
    %cst_41 = arith.constant dense<0.000000e+00> : vector<16x8xf32>
    %93 = tpu.matmul %90, %83, %cst_41 {dimension_numbers = #tpu.dot_dimension_numbers<[1], [0], [0], [1], [0, 0, 1, 1], [], []>} : vector<16x16xf32>, vector<16x8xf32>, vector<16x8xf32> -> vector<16x8xf32>
    %94 = tpu.reciprocal %92 : vector<16x1xf32> -> vector<16x1xf32>
    %95 = vector.broadcast %94 : vector<16x1xf32> to vector<16x8xf32>
    %96 = arith.mulf %93, %95 : vector<16x8xf32>
    %c16_42 = arith.constant 16 : index
    %c0_43 = arith.constant 0 : index
    %97 = vector.load %arg4[%c16_42, %c0_43] : memref<32x32xf32, #tpu.memory_space<vmem>>, vector<8x32xf32>
    %cst_44 = arith.constant dense<0.000000e+00> : vector<16x32xf32>
    %98 = tpu.matmul %96, %97, %cst_44 {dimension_numbers = #tpu.dot_dimension_numbers<[1], [0], [0], [1], [0, 0, 1, 1], [], []>} : vector<16x8xf32>, vector<8x32xf32>, vector<16x32xf32> -> vector<16x32xf32>
    %99 = arith.addf %80, %98 : vector<16x32xf32>
    %100 = vector.extract_strided_slice %41 {offsets = [0, 24], sizes = [16, 8], strides = [1, 1]} : vector<16x96xf32> to vector<16x8xf32>
    %101 = vector.extract_strided_slice %41 {offsets = [0, 56], sizes = [16, 8], strides = [1, 1]} : vector<16x96xf32> to vector<16x8xf32>
    %102 = vector.extract_strided_slice %41 {offsets = [0, 88], sizes = [16, 8], strides = [1, 1]} : vector<16x96xf32> to vector<16x8xf32>
    %cst_45 = arith.constant dense<0.000000e+00> : vector<16x16xf32>
    %103 = tpu.matmul %100, %101, %cst_45 {dimension_numbers = #tpu.dot_dimension_numbers<[1], [1], [0], [0], [0, 0, 1, 0], [], []>} : vector<16x8xf32>, vector<16x8xf32>, vector<16x16xf32> -> vector<16x16xf32>
    %104 = arith.addf %103, %1 : vector<16x16xf32>
    %cst_46 = arith.constant dense<0xFF800000> : vector<16xf32>
    %105 = vector.multi_reduction <maximumf>, %104, %cst_46 [1] : vector<16x16xf32> to vector<16xf32>
    %106 = vector.shape_cast %105 : vector<16xf32> to vector<16x1xf32>
    %107 = vector.broadcast %106 : vector<16x1xf32> to vector<16x16xf32>
    %108 = arith.subf %104, %107 : vector<16x16xf32>
    %109 = math.exp %108 : vector<16x16xf32>
    %cst_47 = arith.constant dense<0.000000e+00> : vector<16xf32>
    %110 = vector.multi_reduction <add>, %109, %cst_47 [1] : vector<16x16xf32> to vector<16xf32>
    %111 = vector.shape_cast %110 : vector<16xf32> to vector<16x1xf32>
    %cst_48 = arith.constant dense<0.000000e+00> : vector<16x8xf32>
    %112 = tpu.matmul %109, %102, %cst_48 {dimension_numbers = #tpu.dot_dimension_numbers<[1], [0], [0], [1], [0, 0, 1, 1], [], []>} : vector<16x16xf32>, vector<16x8xf32>, vector<16x8xf32> -> vector<16x8xf32>
    %113 = tpu.reciprocal %111 : vector<16x1xf32> -> vector<16x1xf32>
    %114 = vector.broadcast %113 : vector<16x1xf32> to vector<16x8xf32>
    %115 = arith.mulf %112, %114 : vector<16x8xf32>
    %c24 = arith.constant 24 : index
    %c0_49 = arith.constant 0 : index
    %116 = vector.load %arg4[%c24, %c0_49] : memref<32x32xf32, #tpu.memory_space<vmem>>, vector<8x32xf32>
    %cst_50 = arith.constant dense<0.000000e+00> : vector<16x32xf32>
    %117 = tpu.matmul %115, %116, %cst_50 {dimension_numbers = #tpu.dot_dimension_numbers<[1], [0], [0], [1], [0, 0, 1, 1], [], []>} : vector<16x8xf32>, vector<8x32xf32>, vector<16x32xf32> -> vector<16x32xf32>
    %118 = arith.addf %99, %117 : vector<16x32xf32>
    %119 = arith.addf %15, %118 : vector<16x32xf32>
    %120 = vector.broadcast %4 : vector<1x32xf32> to vector<16x32xf32>
    %121 = arith.addf %119, %120 : vector<16x32xf32>
    %cst_51 = arith.constant dense<0.000000e+00> : vector<16xf32>
    %122 = vector.multi_reduction <add>, %121, %cst_51 [1] : vector<16x32xf32> to vector<16xf32>
    %123 = vector.shape_cast %122 : vector<16xf32> to vector<16x1xf32>
    %cst_52 = arith.constant 3.200000e+01 : f32
    %124 = vector.broadcast %cst_52 : f32 to vector<16x1xf32>
    %125 = arith.divf %123, %124 : vector<16x1xf32>
    %126 = vector.broadcast %125 : vector<16x1xf32> to vector<16x32xf32>
    %127 = arith.subf %121, %126 : vector<16x32xf32>
    %128 = arith.mulf %127, %127 : vector<16x32xf32>
    %cst_53 = arith.constant dense<0.000000e+00> : vector<16xf32>
    %129 = vector.multi_reduction <add>, %128, %cst_53 [1] : vector<16x32xf32> to vector<16xf32>
    %130 = vector.shape_cast %129 : vector<16xf32> to vector<16x1xf32>
    %cst_54 = arith.constant 3.200000e+01 : f32
    %131 = vector.broadcast %cst_54 : f32 to vector<16x1xf32>
    %132 = arith.divf %130, %131 : vector<16x1xf32>
    %133 = vector.broadcast %125 : vector<16x1xf32> to vector<16x32xf32>
    %134 = arith.subf %121, %133 : vector<16x32xf32>
    %cst_55 = arith.constant 9.99999997E-7 : f32
    %135 = vector.broadcast %cst_55 : f32 to vector<16x1xf32>
    %136 = arith.addf %132, %135 : vector<16x1xf32>
    %137 = math.rsqrt %136 : vector<16x1xf32>
    %138 = vector.broadcast %137 : vector<16x1xf32> to vector<16x32xf32>
    %139 = arith.mulf %134, %138 : vector<16x32xf32>
    %140 = vector.broadcast %7 : vector<1x32xf32> to vector<16x32xf32>
    %141 = arith.mulf %139, %140 : vector<16x32xf32>
    %142 = vector.broadcast %8 : vector<1x32xf32> to vector<16x32xf32>
    %143 = arith.addf %141, %142 : vector<16x32xf32>
    %c0_56 = arith.constant 0 : index
    %c0_57 = arith.constant 0 : index
    %144 = vector.load %arg5[%c0_56, %c0_57] : memref<32x64xf32, #tpu.memory_space<vmem>>, vector<32x64xf32>
    %cst_58 = arith.constant dense<0.000000e+00> : vector<16x64xf32>
    %145 = tpu.matmul %143, %144, %cst_58 {dimension_numbers = #tpu.dot_dimension_numbers<[1], [0], [0], [1], [0, 0, 1, 1], [], []>} : vector<16x32xf32>, vector<32x64xf32>, vector<16x64xf32> -> vector<16x64xf32>
    %146 = vector.broadcast %9 : vector<1x64xf32> to vector<16x64xf32>
    %147 = arith.addf %145, %146 : vector<16x64xf32>
    %cst_59 = arith.constant 0.000000e+00 : f32
    %148 = vector.broadcast %cst_59 : f32 to vector<16x64xf32>
    %149 = arith.maximumf %147, %148 : vector<16x64xf32>
    %c0_60 = arith.constant 0 : index
    %c0_61 = arith.constant 0 : index
    %150 = vector.load %arg6[%c0_60, %c0_61] : memref<64x32xf32, #tpu.memory_space<vmem>>, vector<64x32xf32>
    %cst_62 = arith.constant dense<0.000000e+00> : vector<16x32xf32>
    %151 = tpu.matmul %149, %150, %cst_62 {dimension_numbers = #tpu.dot_dimension_numbers<[1], [0], [0], [1], [0, 0, 1, 1], [], []>} : vector<16x64xf32>, vector<64x32xf32>, vector<16x32xf32> -> vector<16x32xf32>
    %152 = vector.broadcast %10 : vector<1x32xf32> to vector<16x32xf32>
    %153 = arith.addf %151, %152 : vector<16x32xf32>
    %154 = arith.addf %121, %153 : vector<16x32xf32>
    %cst_63 = arith.constant dense<0.000000e+00> : vector<8x32xf32>
    %155 = tpu.matmul %2, %154, %cst_63 {dimension_numbers = #tpu.dot_dimension_numbers<[1], [0], [0], [1], [0, 0, 1, 1], [], []>} : vector<8x16xf32>, vector<16x32xf32>, vector<8x32xf32> -> vector<8x32xf32>
    %c0_64 = arith.constant 0 : index
    %c0_65 = arith.constant 0 : index
    %156 = vector.load %arg7[%c0_64, %c0_65] : memref<32x128xf32, #tpu.memory_space<vmem>>, vector<32x128xf32>
    %cst_66 = arith.constant dense<0.000000e+00> : vector<8x128xf32>
    %157 = tpu.matmul %155, %156, %cst_66 {dimension_numbers = #tpu.dot_dimension_numbers<[1], [0], [0], [1], [0, 0, 1, 1], [], []>} : vector<8x32xf32>, vector<32x128xf32>, vector<8x128xf32> -> vector<8x128xf32>
    %158 = vector.broadcast %11 : vector<1x128xf32> to vector<8x128xf32>
    %159 = arith.addf %157, %158 : vector<8x128xf32>
    %c0_67 = arith.constant 0 : index
    %c0_68 = arith.constant 0 : index
    %160 = vector.load %arg9[%c0_67, %c0_68] : memref<8x128xf32, #tpu.memory_space<vmem>>, vector<8x128xf32>
    tpu.vector_store %arg9[%c0_67, %c0_68], %159 {strides = array<i32>} : memref<8x128xf32, #tpu.memory_space<vmem>>, vector<8x128xf32>,
    return
  }
  func.func @transform_0(%arg0: i32) -> (i32, i32) {
    %c0_i32 = arith.constant 0 : i32
    %c0_i32_0 = arith.constant 0 : i32
    %c0_i32_1 = arith.constant 0 : i32
    return %c0_i32, %c0_i32_0 : i32, i32
  }
  func.func @transform_1(%arg0: i32) -> (i32, i32) {
    %c0_i32 = arith.constant 0 : i32
    %c0_i32_0 = arith.constant 0 : i32
    %c0_i32_1 = arith.constant 0 : i32
    return %c0_i32, %c0_i32_0 : i32, i32
  }
  func.func @transform_2(%arg0: i32) -> (i32, i32) {
    %c0_i32 = arith.constant 0 : i32
    %c0_i32_0 = arith.constant 0 : i32
    %c0_i32_1 = arith.constant 0 : i32
    return %c0_i32, %c0_i32_0 : i32, i32
  }
  func.func @transform_3(%arg0: i32) -> (i32, i32) {
    %c0_i32 = arith.constant 0 : i32
    %c0_i32_0 = arith.constant 0 : i32
    %c0_i32_1 = arith.constant 0 : i32
    return %c0_i32, %c0_i32_0 : i32, i32
  }
  func.func @transform_4(%arg0: i32) -> (i32, i32) {
    %c0_i32 = arith.constant 0 : i32
    %c0_i32_0 = arith.constant 0 : i32
    %c0_i32_1 = arith.constant 0 : i32
    return %c0_i32, %c0_i32_0 : i32, i32
  }
  func.func @transform_5(%arg0: i32) -> (i32, i32) {
    %c0_i32 = arith.constant 0 : i32
    %c0_i32_0 = arith.constant 0 : i32
    %c0_i32_1 = arith.constant 0 : i32
    return %c0_i32, %c0_i32_0 : i32, i32
  }
  func.func @transform_6(%arg0: i32) -> (i32, i32) {
    %c0_i32 = arith.constant 0 : i32
    %c0_i32_0 = arith.constant 0 : i32
    %c0_i32_1 = arith.constant 0 : i32
    return %c0_i32, %c0_i32_0 : i32, i32
  }
  func.func @transform_7(%arg0: i32) -> (i32, i32) {
    %c0_i32 = arith.constant 0 : i32
    %c0_i32_0 = arith.constant 0 : i32
    %c0_i32_1 = arith.constant 0 : i32
    return %c0_i32, %c0_i32_0 : i32, i32
  }
  func.func @transform_8(%arg0: i32) -> (i32, i32) {
    %c0_i32 = arith.constant 0 : i32
    %c0_i32_0 = arith.constant 0 : i32
    %c0_i32_1 = arith.constant 0 : i32
    return %c0_i32, %c0_i32_0 : i32, i32
  }
}

</mosaic_0001>

<bundles_post_ra>
// kernel: tpu_custom_call.1
= control target key start
LH: loop header
LB: loop body
LE: loop exit
PB: predicated region body
PF: predicated region fallthrough
CT: control target
= control target key end

     0   :  { %13 = vsyncpa [#allocation3], 0  ;;  %s1601_s0 = inlined_call_operand.hbm [shape: f32[16,16], index: 0, kind: input, shape index: {}]   ;;  %s1602_s1 = inlined_call_operand.hbm [shape: f32[16,32], index: 1, kind: input, shape index: {}]   ;;  %s1603_s2 = inlined_call_operand.vmem [shape: f32[32,96], index: 2, kind: input, shape index: {}]   ;;  %s1604_s3 = inlined_call_operand.vmem [shape: f32[32,32], index: 3, kind: input, shape index: {}]   ;;  %s1605_s4 = inlined_call_operand.vmem [shape: f32[32,64], index: 4, kind: input, shape index: {}]   ;;  %s1606_s5 = inlined_call_operand.vmem [shape: f32[64,32], index: 5, kind: input, shape index: {}]   ;;  %s1607_s6 = inlined_call_operand.hbm [shape: f32[32,128], index: 6, kind: input, shape index: {}]   ;;  %s1608_s7 = inlined_call_operand.hbm [shape: f32[112,128], index: 7, kind: input, shape index: {}]   ;;  %s1609_s8 = inlined_call_operand.hbm [shape: f32[8,128], index: 8, kind: output, shape index: {}]  }
   0x1   :  { %14 = vsyncpa [#allocation6], 0 }
   0x2   :  { %15 = vsyncpa [#allocation9], 0 }
   0x3   :  { %16 = vsyncpa [#allocation4], 0  ;;  %s34_s29 = sshll.u32 %s1602_s1, 4  ;;  %s1307_s30 = smov [#allocation5]   ;;  %s35_s29 = int_to_ptr.hbm [resolvable:$true] %s34_s29 }
   0x4   :  { %s36_s9 = sshll.u32 %s1307_s30, 4  ;;  %s21_s12 = sshll.u32 %s1601_s0, 4  ;;  %s37_s9 = int_to_ptr.vmem [resolvable:$true] %s36_s9  ;;  %s22_s12 = int_to_ptr.hbm [resolvable:$true] %s21_s12 }
   0x5   :  { %s1308_s13 = smov 128   ;;  %s1309_s14 = smov 8  }
   0x6   :  { %42 = dma.hbm_to_vmem [thread:$0]  %s35_s29, 256, %s37_s9, [#allocation6], %s1308_s13, %s1308_s13, %s1309_s14  }
   0x7   :  { %s1310_s15 = smov [#allocation2]   ;;  %s55_s19 = sshll.u32 %s1607_s6, 4  ;;  %s56_s19 = int_to_ptr.hbm [resolvable:$true] %s55_s19 }
   0x8   :  { %s23_s16 = sshll.u32 %s1310_s15, 4  ;;  %s68_s21 = sshll.u32 %s1608_s7, 4  ;;  %s24_s16 = int_to_ptr.vmem [resolvable:$true] %s23_s16  ;;  %s69_s21 = int_to_ptr.hbm [resolvable:$true] %s68_s21 }
   0x9   :  { %29 = dma.hbm_to_vmem [thread:$0]  %s22_s12, 256, %s24_s16, [#allocation3], %s1308_s13, %s1308_s13, %s1309_s14  }
   0xa   :  { %s1311_s22 = smov [#allocation7]   ;;  %s1312_s0 = smov [#allocation8]  }
   0xb   :  { %s57_s23 = sshll.u32 %s1311_s22, 4  ;;  %s70_s24 = sshll.u32 %s1312_s0, 4  ;;  %s58_s23 = int_to_ptr.vmem [resolvable:$true] %s57_s23  ;;  %s71_s24 = int_to_ptr.vmem [resolvable:$true] %s70_s24 }
   0xc   :  { %63 = dma.hbm_to_vmem [thread:$0]  %s56_s19, 512, %s58_s23, [#allocation6], %s1308_s13, %s1308_s13, %s1309_s14  }
   0xd   :  { %76 = dma.hbm_to_vmem [thread:$0]  %s69_s21, 1792, %s71_s24, [#allocation9], %s1308_s13, %s1308_s13, %s1309_s14  }
   0xe   :  { %1299 = dma.done.wait [#allocation3], 256  }
   0xf   :  { %1300 = vsyncadd [#allocation3], 4294967040 }
  0x10   :  { %1301 = dma.done.wait [#allocation6], 768  }
  0x11   :  { %1302 = vsyncadd [#allocation6], 4294966528 }
  0x12   :  { %1303 = dma.done.wait [#allocation9], 1792  }
  0x13   :  { %1304 = vsyncadd [#allocation9], 4294965504  ;;  %v110_v0 = vld [vmem:[#allocation5 + $0x8] sm:$0xff]  ;;  %v109_v1 = vld [vmem:[#allocation5] sm:$0xff]  ;;  %vm111_vm0 = vcmask 130048   ;;  %vm141_vm1 = vcmask 261120  }
  0x14   :  { %132 = vmatpush.msra.mxu0 %v110_v0  ;;  %v107_v2 = vld [vmem:[#allocation2] sm:$0xff]  ;;  %v108_v3 = vld [vmem:[#allocation2 + $0x8] sm:$0xff]  ;;  %v1313_v12 = vmov 32.0   ;;  %v202_v29 = vld [vmem:[%s1603_s2 + $0x18] sm:$0xff]  ;;  %s1315_s9 = smov 64   ;;  %s1316_s10 = smov 88  }
  0x15   :  { %v93_v4 = vld [vmem:[#allocation8] sm:$0xff]  ;;  %v94_v8 = vld [vmem:[#allocation8 + $0x8] sm:$0xff]  ;;  %1137 = vrcp.f32 %v1313_v12  ;;  %222 = vmatpush.msra.mxu1 %v202_v29  ;;  %v201_v30 = vld [vmem:[%s1603_s2 + $0x10] sm:$0xff]  ;;  %s1317_s11 = smov 72   ;;  %s1318_s12 = smov 120   ;;  %vm239_vm9 = vcmask 64512  }
  0x16   :  { %133 = vmatpush.msra.mxu0 %v109_v1  ;;  %v200_v31 = vld [vmem:[%s1603_s2 + $0x8] sm:$0xff]  ;;  %v199_v32 = vld [vmem:[%s1603_s2] sm:$0xff]  ;;  %v1128_v47 = vld [vmem:[#allocation8 + $0x38] ss:$0 sm:$0xff]  ;;  %s1314_s2 = smov 96   ;;  %s1319_s13 = smov 80  }
  0x17   :  { %1047 = vmatmul.msk.f32.vlgmr.msra.gmra.mxu0 %vm111_vm0, %v107_v2  ;;  %223 = vmatpush.msra.mxu1 %v201_v30  ;;  %v1129_v51 = vld [vmem:[#allocation8 + $0x40] ss:$0 sm:$0xff]  ;;  %v1130_v62 = vld [vmem:[#allocation8 + $0x28] ss:$0 sm:$0xff]  ;;  %s1320_s14 = smov 104   ;;  %s1321_s17 = smov 112  }
  0x18   :  { %s1322_s18 = smov 56   ;;  %s1323_s19 = smov 40  }
  0x19   :  { %224 = vmatpush.msra.mxu1 %v200_v31  ;;  %s1324_s1 = smov 48   ;;  %s1035_s0 = sshll.u32 %s1609_s8, 4  ;;  %s1036_s0 = int_to_ptr.hbm [resolvable:$true] %s1035_s0 }
  0x1b   :  { %v1138_v13 = vpop.eup %1137  ;;  %225 = vmatpush.msra.mxu1 %v199_v32 }
  0x1c   :  { %v149_v14 = vmul.f32 32.0, %v1138_v13  ;;  %vm153_vm2 = vweird.f32 %v1138_v13 }
  0x1e   :  { %v150_v15 = vsub.f32 1.0, %v149_v14 }
  0x1f   :  { %1048 = vmatmul.msk.f32.gmra.mxu0 %vm111_vm0, %v108_v3 }
  0x20   :  { %v151_v16 = vmul.f32 %v1138_v13, %v150_v15 }
  0x22   :  { %v152_v17 = vadd.f32 %v1138_v13, %v151_v16 }
  0x24   :  { %v1393_v18 = vsel %vm153_vm2, %v1138_v13, %v152_v17  ;;  %v1449_v13 = vld [vmem:[#allocation8 + $0x10] sm:$0xff]  ;;  %v1453_v17 = vld [vmem:[#allocation8 + $0x18] sm:$0xff] }
  0x94   :  { %v135_v5 = vpop.f32.mrf.mxu0 }
  0x95   :  { %v1385_v6 = vadd.f32 %v135_v5, %v93_v4  ;;  %v354_v4 = vld [vmem:[%s1604_s3] sm:$0xff] }
  0x97   :  { %v142_v7 = vsel %vm141_vm1, %v1385_v6, 0.0 }
  0x98   :  { %143 = vadd.xlane.f32.xlu0 %v142_v7 }
  0x9c   :  { %v138_v9 = vpop.f32.mrf.mxu0 }
  0x9d   :  { %v1389_v10 = vadd.f32 %v138_v9, %v94_v8 }
  0x9f   :  { %v145_v11 = vsel %vm141_vm1, %v1389_v10, 0.0 }
  0xa0   :  { %146 = vadd.xlane.f32.xlu0 %v145_v11 }
 0x10b   :  { %v144_v19 = vpop.xlane.xlu0 %143 }
 0x10c   :  { %v155_v20 = vmul.f32 %v1393_v18, %v144_v19 }
 0x10e   :  { %v157_v21 = vsub.f32 %v1385_v6, %v155_v20 }
 0x110   :  { %v159_v22 = vmul.f32 %v157_v21, %v157_v21 }
 0x112   :  { %v161_v23 = vsel %vm141_vm1, %v159_v22, 0.0 }
 0x113   :  { %162 = vadd.xlane.f32.xlu1 %v161_v23  ;;  %v147_v24 = vpop.xlane.xlu0 %146 }
 0x114   :  { %v156_v25 = vmul.f32 %v1393_v18, %v147_v24 }
 0x116   :  { %v158_v26 = vsub.f32 %v1389_v10, %v156_v25 }
 0x118   :  { %v160_v27 = vmul.f32 %v158_v26, %v158_v26 }
 0x11a   :  { %v164_v28 = vsel %vm141_vm1, %v160_v27, 0.0 }
 0x11b   :  { %165 = vadd.xlane.f32.xlu1 %v164_v28 }
 0x186   :  { %v163_v33 = vpop.xlane.xlu1 %162 }
 0x187   :  { %v167_v34 = vmul.f32 %v163_v33, %v1393_v18 }
 0x189   :  { %v169_v35 = vadd.f32 1e-06, %v167_v34 }
 0x18b   :  { %1139 = vrsqrt.f32 %v169_v35  ;;  %vm177_vm4 = vweird.f32 %v169_v35 }
 0x18e   :  { %v166_v36 = vpop.xlane.xlu1 %165 }
 0x18f   :  { %v168_v37 = vmul.f32 %v166_v36, %v1393_v18 }
 0x191   :  { %v1140_v38 = vpop.eup %1139  ;;  %v170_v39 = vadd.f32 1e-06, %v168_v37 }
 0x192   :  { %v172_v40 = vmul.f32 %v1140_v38, %v169_v35  ;;  %vm178_vm3 = vweird.f32 %v1140_v38 }
 0x193   :  { %1141 = vrsqrt.f32 %v170_v39  ;;  %vm179_vm5 = vmor %vm177_vm4, %vm178_vm3  ;;  %vm187_vm7 = vweird.f32 %v170_v39 }
 0x194   :  { %v173_v41 = vmul.f32 %v1140_v38, %v172_v40 }
 0x196   :  { %v174_v42 = vmul.f32 0.5, %v173_v41 }
 0x198   :  { %v175_v43 = vsub.f32 1.5, %v174_v42 }
 0x199   :  { %v1142_v44 = vpop.eup %1141 }
 0x19a   :  { %v176_v45 = vmul.f32 %v1140_v38, %v175_v43  ;;  %v182_v46 = vmul.f32 %v1142_v44, %v170_v39  ;;  %vm188_vm6 = vweird.f32 %v1142_v44 }
 0x19b   :  { %vm189_vm8 = vmor %vm187_vm7, %vm188_vm6 }
 0x19c   :  { %v180_v48 = vsel %vm179_vm5, %v1140_v38, %v176_v45  ;;  %v183_v49 = vmul.f32 %v1142_v44, %v182_v46 }
 0x19d   :  { %v191_v50 = vmul.f32 %v180_v48, %v157_v21 }
 0x19e   :  { %v184_v52 = vmul.f32 0.5, %v183_v49 }
 0x19f   :  { %v194_v53 = vmul.f32 %v1128_v47, %v191_v50 }
 0x1a0   :  { %v185_v54 = vsub.f32 1.5, %v184_v52 }
 0x1a1   :  { %v197_v55 = vadd.f32 %v1129_v51, %v194_v53 }
 0x1a2   :  { %v186_v56 = vmul.f32 %v1142_v44, %v185_v54 }
 0x1a3   :  { %1049 = vmatmul.msk.f32.vlgmr.msra.gmra.mxu1 %vm141_vm1, %v197_v55 }
 0x1a4   :  { %v190_v57 = vsel %vm189_vm8, %v1142_v44, %v186_v56 }
 0x1a5   :  { %v192_v58 = vmul.f32 %v190_v57, %v158_v26 }
 0x1a7   :  { %v195_v59 = vmul.f32 %v1128_v47, %v192_v58 }
 0x1a9   :  { %v198_v60 = vadd.f32 %v1129_v51, %v195_v59 }
 0x1ab   :  { %1050 = vmatmul.msk.f32.gmra.mxu1 %vm141_vm1, %v198_v60 }
 0x220   :  { %v227_v61 = vpop.f32.mrf.mxu1 }
 0x221   :  { %v1420_v1 = vadd.f32 %v1130_v62, %v227_v61 }
 0x228   :  { %v230_v63 = vpop.f32.mrf.mxu1 }
 0x229   :  { %v1417_v0 = vadd.f32 %v1130_v62, %v230_v63 }
 0x22b   :  { %237 = vrot.lane.b32.xlu2 %v1417_v0, %s1314_s2  ;;  %v1425_v2 = vpack.i.bf16 %v1420_v1, %v1417_v0 }
 0x233   :  { %235 = vrot.lane.b32.xlu2 %v1420_v1, %s1314_s2 }
 0x23b   :  { %1109 = vrot.lane.b32.xlu2 %v1425_v2, %s1315_s9 }
 0x243   :  { %361 = vrot.lane.b32.xlu2 %v1417_v0, %s1316_s10 }
 0x24b   :  { %696 = vrot.lane.b32.xlu2 %v1417_v0, %s1317_s11 }
 0x253   :  { %357 = vrot.lane.b32.xlu2 %v1417_v0, %s1318_s12 }
 0x25b   :  { %542 = vrot.lane.b32.xlu2 %v1417_v0, %s1319_s13 }
 0x263   :  { %690 = vrot.lane.b32.xlu2 %v1420_v1, %s1320_s14 }
 0x26b   :  { %692 = vrot.lane.b32.xlu2 %v1417_v0, %s1320_s14 }
 0x285   :  { %v238_v3 = vpop.permute.xlu2 %237 }
 0x286   :  { %1051 = vmatpush.xpose.msk.msra.mxu2 %vm239_vm9, %v238_v3 }
 0x28d   :  { %v236_v5 = vpop.permute.xlu2 %235 }
 0x28e   :  { %1052 = vmatpush.xpose.msk.msra.mxu2 %vm239_vm9, %v236_v5 }
 0x291   :  { %1053 = vmatmul.msk.f32.vlgmr.msra.gmra.mxu2 %vm239_vm9, %v1420_v1 }
 0x292   :  { %528 = vmatpush.msrb.mxu2 %v354_v4 }
 0x295   :  { %v1110_v7 = vpop.permute.xlu2 %1109 }
 0x296   :  { %v1111_v8 = vunpack.i.l.bf16 %v1110_v7  ;;  %v1112_v9 = vunpack.i.h.bf16 %v1110_v7 }
 0x298   :  { %315 = vmatpush.msra.mxu3 %v1111_v8 }
 0x299   :  { %1054 = vmatmul.msk.f32.gmra.mxu2 %vm239_vm9, %v1417_v0 }
 0x29a   :  { %316 = vmatpush.msra.mxu3 %v1112_v9 }
 0x29d   :  { %v362_v11 = vpop.permute.xlu2 %361 }
 0x29e   :  { %1057 = vmatpush.xpose.msk.msrb.mxu0 %vm239_vm9, %v362_v11 }
 0x2a5   :  { %v697_v12 = vpop.permute.xlu2 %696 }
 0x2a6   :  { %1075 = vmatpush.xpose.msk.msra.mxu2 %vm239_vm9, %v697_v12 }
 0x2ad   :  { %v358_v27 = vpop.permute.xlu2 %357 }
 0x2b5   :  { %v543_v33 = vpop.permute.xlu2 %542 }
 0x2bd   :  { %v691_v5 = vpop.permute.xlu2 %690 }
 0x314   :  { %v265_v14 = vpop.f32.mrf.mxu2 }
 0x315   :  { %v266_v15 = vadd.f32 %v265_v14, %v1449_v13 }
 0x317   :  { %v271_v16 = vsel %vm111_vm0, %v266_v15, -inf }
 0x318   :  { %272 = vmax.xlane.f32.xlu0 %v271_v16 }
 0x31c   :  { %v268_v19 = vpop.f32.mrf.mxu2 }
 0x31d   :  { %v269_v20 = vadd.f32 %v268_v19, %v1453_v17 }
 0x31f   :  { %v274_v21 = vsel %vm111_vm0, %v269_v20, -inf }
 0x320   :  { %275 = vmax.xlane.f32.xlu1 %v274_v21 }
 0x32c   :  { %359 = vrot.lane.b32.xlu0 %v1420_v1, %s1316_s10 }
 0x334   :  { %694 = vrot.lane.b32.xlu0 %v1420_v1, %s1317_s11 }
 0x339   :  { %355 = vrot.lane.b32.xlu1 %v1420_v1, %s1318_s12 }
 0x341   :  { %540 = vrot.lane.b32.xlu1 %v1420_v1, %s1319_s13 }
 0x38b   :  { %v273_v22 = vpop.xlane.xlu0 %272 }
 0x38c   :  { %v277_v23 = vsub.f32 %v266_v15, %v273_v22  ;;  %v693_v15 = vpop.permute.xlu2 %692 }
 0x38e   :  { %v279_v24 = vmul.f32 1.442695, %v277_v23 }
 0x390   :  { %1143 = vpow2.f32 %v279_v24 }
 0x393   :  { %v276_v25 = vpop.xlane.xlu1 %275 }
 0x394   :  { %v278_v26 = vsub.f32 %v269_v20, %v276_v25 }
 0x396   :  { %v1144_v28 = vpop.eup %1143  ;;  %v281_v29 = vmul.f32 1.442695, %v278_v26 }
 0x397   :  { %1055 = vmatmul.msk.f32.vlgmr.msra.gmra.mxu3 %vm111_vm0, %v1144_v28  ;;  %v283_v30 = vsel %vm111_vm0, %v1144_v28, 0.0 }
 0x398   :  { %1145 = vpow2.f32 %v281_v29  ;;  %284 = vadd.xlane.f32.xlu0 %v283_v30 }
 0x39e   :  { %v1146_v31 = vpop.eup %1145  ;;  %v360_v32 = vpop.permute.xlu0 %359 }
 0x39f   :  { %1056 = vmatmul.msk.f32.gmra.mxu3 %vm111_vm0, %v1146_v31  ;;  %1058 = vmatpush.xpose.msk.msrb.mxu0 %vm239_vm9, %v360_v32  ;;  %v286_v34 = vsel %vm111_vm0, %v1146_v31, 0.0 }
 0x3a0   :  { %287 = vadd.xlane.f32.xlu1 %v286_v34 }
 0x3a3   :  { %1067 = vmatpush.xpose.msk.msra.mxu0 %vm239_vm9, %v543_v33 }
 0x3a6   :  { %v695_v35 = vpop.permute.xlu0 %694 }
 0x3a7   :  { %1076 = vmatpush.xpose.msk.msra.mxu2 %vm239_vm9, %v695_v35 }
 0x3ab   :  { %v356_v36 = vpop.permute.xlu1 %355 }
 0x3ac   :  { %536 = vrot.lane.b32.xlu0 %v1420_v1, %s1321_s17  ;;  %1059 = vmatmul.msk.f32.vlgmr.msrb.gmra.mxu0 %vm239_vm9, %v356_v36 }
 0x3b3   :  { %v541_v37 = vpop.permute.xlu1 %540 }
 0x3b4   :  { %1060 = vmatmul.msk.f32.gmra.mxu0 %vm239_vm9, %v358_v27 }
 0x3b5   :  { %1068 = vmatpush.xpose.msk.msra.mxu0 %vm239_vm9, %v541_v37 }
 0x3b9   :  { %538 = vrot.lane.b32.xlu1 %v1417_v0, %s1321_s17 }
 0x3c1   :  { %1114 = vrot.lane.b32.xlu1 %v1425_v2, %s1322_s18 }
 0x40b   :  { %v285_v38 = vpop.xlane.xlu0 %284 }
 0x40c   :  { %1147 = vrcp.f32 %v285_v38  ;;  %v335_v43 = vand.u32 2147483648, %v285_v38  ;;  %v333_v45 = vand.u32 2147483647, %v285_v38  ;;  %vm329_vm11 = vweird.f32 %v285_v38 }
 0x40e   :  { %v336_v49 = vor.u32 1.1754944e-38, %v335_v43  ;;  %vm334_vm13 = vcmp.eq.f32.partialorder %v333_v45, 8.507059e+37 }
 0x412   :  { %v1148_v39 = vpop.eup %1147 }
 0x413   :  { %v325_v40 = vmul.f32 %v1148_v39, %v285_v38  ;;  %v288_v41 = vpop.xlane.xlu1 %287  ;;  %vm330_vm10 = vweird.f32 %v1148_v39 }
 0x414   :  { %1149 = vrcp.f32 %v288_v41  ;;  %vm331_vm12 = vmor %vm329_vm11, %vm330_vm10  ;;  %v349_v56 = vand.u32 2147483648, %v288_v41  ;;  %v347_v58 = vand.u32 2147483647, %v288_v41  ;;  %vm343_vm15 = vweird.f32 %v288_v41 }
 0x415   :  { %v326_v42 = vsub.f32 1.0, %v325_v40 }
 0x416   :  { %v350_v60 = vor.u32 1.1754944e-38, %v349_v56  ;;  %vm348_vm3 = vcmp.eq.f32.partialorder %v347_v58, 8.507059e+37 }
 0x417   :  { %v327_v44 = vmul.f32 %v1148_v39, %v326_v42 }
 0x419   :  { %v328_v46 = vadd.f32 %v1148_v39, %v327_v44 }
 0x41a   :  { %v1150_v47 = vpop.eup %1149  ;;  %v318_v48 = vpop.f32.mrf.mxu3 }
 0x41b   :  { %v339_v50 = vmul.f32 %v1150_v47, %v288_v41  ;;  %v332_v51 = vsel %vm331_vm12, %v1148_v39, %v328_v46  ;;  %vm344_vm14 = vweird.f32 %v1150_v47 }
 0x41c   :  { %v337_v52 = vsel %vm334_vm13, %v336_v49, %v332_v51  ;;  %vm345_vm2 = vmor %vm343_vm15, %vm344_vm14 }
 0x41d   :  { %v340_v53 = vsub.f32 1.0, %v339_v50  ;;  %v352_v54 = vmul.f32 %v337_v52, %v318_v48 }
 0x41e   :  { %v537_v55 = vpop.permute.xlu0 %536 }
 0x41f   :  { %1065 = vmatmul.msk.f32.vlgmr.msrb.gmra.mxu2 %vm239_vm9, %v352_v54  ;;  %1069 = vmatmul.msk.f32.vlgmr.msra.gmra.mxu0 %vm239_vm9, %v537_v55  ;;  %v341_v57 = vmul.f32 %v1150_v47, %v340_v53  ;;  %v477_v55 = vld [vmem:[%s1604_s3 + $0x8] sm:$0xff] }
 0x420   :  { %499 = vmatpush.msrb.mxu1 %v477_v55 }
 0x421   :  { %v342_v59 = vadd.f32 %v1150_v47, %v341_v57 }
 0x422   :  { %v321_v62 = vpop.f32.mrf.mxu3 }
 0x423   :  { %v346_v61 = vsel %vm345_vm2, %v1150_v47, %v342_v59 }
 0x424   :  { %v351_v63 = vsel %vm348_vm3, %v350_v60, %v346_v61 }
 0x425   :  { %v353_v0 = vmul.f32 %v351_v63, %v321_v62 }
 0x427   :  { %1066 = vmatmul.msk.f32.gmra.mxu2 %vm239_vm9, %v353_v0 }
 0x429   :  { %v388_v1 = vpop.f32.mrf.mxu0 }
 0x42a   :  { %v389_v3 = vadd.f32 %v388_v1, %v1449_v13 }
 0x42b   :  { %v539_v4 = vpop.permute.xlu1 %538 }
 0x42c   :  { %1070 = vmatmul.msk.f32.gmra.mxu0 %vm239_vm9, %v539_v4  ;;  %v394_v7 = vsel %vm111_vm0, %v389_v3, -inf }
 0x42d   :  { %395 = vmax.xlane.f32.xlu0 %v394_v7 }
 0x42f   :  { %1077 = vmatmul.msk.f32.vlgmr.msra.gmra.mxu2 %vm239_vm9, %v691_v5 }
 0x431   :  { %v391_v8 = vpop.f32.mrf.mxu0 }
 0x432   :  { %v392_v9 = vadd.f32 %v391_v8, %v1453_v17 }
 0x433   :  { %v1115_v11 = vpop.permute.xlu1 %1114 }
 0x434   :  { %v397_v12 = vsel %vm111_vm0, %v392_v9, -inf  ;;  %v1116_v14 = vunpack.i.l.bf16 %v1115_v11  ;;  %v1117_v16 = vunpack.i.h.bf16 %v1115_v11 }
 0x435   :  { %398 = vmax.xlane.f32.xlu2 %v397_v12 }
 0x436   :  { %438 = vmatpush.msrb.mxu3 %v1116_v14 }
 0x437   :  { %1078 = vmatmul.msk.f32.gmra.mxu2 %vm239_vm9, %v693_v15 }
 0x438   :  { %439 = vmatpush.msrb.mxu3 %v1117_v16 }
 0x49c   :  { %v569_v19 = vpop.f32.mrf.mxu0 }
 0x49d   :  { %v570_v20 = vadd.f32 %v569_v19, %v1449_v13 }
 0x49f   :  { %v575_v21 = vsel %vm111_vm0, %v570_v20, -inf }
 0x4a0   :  { %v396_v22 = vpop.xlane.xlu0 %395  ;;  %576 = vmax.xlane.f32.xlu1 %v575_v21 }
 0x4a1   :  { %v400_v23 = vsub.f32 %v389_v3, %v396_v22 }
 0x4a2   :  { %v1490_v24 = vpop.f32.mrf.mxu2 }
 0x4a3   :  { %v402_v25 = vmul.f32 1.442695, %v400_v23 }
 0x4a5   :  { %1151 = vpow2.f32 %v402_v25 }
 0x4a8   :  { %v399_v26 = vpop.xlane.xlu2 %398 }
 0x4a9   :  { %v401_v27 = vsub.f32 %v392_v9, %v399_v26  ;;  %v572_v28 = vpop.f32.mrf.mxu0 }
 0x4aa   :  { %v573_v29 = vadd.f32 %v572_v28, %v1453_v17  ;;  %v1493_v30 = vpop.f32.mrf.mxu2 }
 0x4ab   :  { %v1152_v31 = vpop.eup %1151  ;;  %v404_v32 = vmul.f32 1.442695, %v401_v27 }
 0x4ac   :  { %1061 = vmatmul.msk.f32.vlgmr.msrb.gmra.mxu3 %vm111_vm0, %v1152_v31  ;;  %v578_v33 = vsel %vm111_vm0, %v573_v29, -inf  ;;  %v406_v41 = vsel %vm111_vm0, %v1152_v31, 0.0 }
 0x4ad   :  { %1153 = vpow2.f32 %v404_v32  ;;  %579 = vmax.xlane.f32.xlu2 %v578_v33 }
 0x4b2   :  { %v723_v34 = vpop.f32.mrf.mxu2 }
 0x4b3   :  { %v1154_v35 = vpop.eup %1153  ;;  %v724_v36 = vadd.f32 %v723_v34, %v1449_v13 }
 0x4b4   :  { %1062 = vmatmul.msk.f32.gmra.mxu3 %vm111_vm0, %v1154_v35  ;;  %v409_v13 = vsel %vm111_vm0, %v1154_v35, 0.0 }
 0x4b5   :  { %v729_v37 = vsel %vm111_vm0, %v724_v36, -inf }
 0x4b6   :  { %730 = vmax.xlane.f32.xlu0 %v729_v37  ;;  %v812_v37 = vld [vmem:[%s1604_s3 + $0x18] sm:$0xff] }
 0x4b9   :  { %1124 = vrot.lane.b32.xlu1 %v1425_v2, %s1323_s19 }
 0x4ba   :  { %v726_v38 = vpop.f32.mrf.mxu2 }
 0x4bb   :  { %v727_v39 = vadd.f32 %v726_v38, %v1453_v17 }
 0x4bd   :  { %v732_v40 = vsel %vm111_vm0, %v727_v39, -inf }
 0x4be   :  { %733 = vmax.xlane.f32.xlu2 %v732_v40 }
 0x4c6   :  { %407 = vadd.xlane.f32.xlu2 %v406_v41 }
 0x4ca   :  { %1119 = vrot.lane.b32.xlu0 %v1425_v2, %s1324_s1 }
 0x4ce   :  { %410 = vadd.xlane.f32.xlu2 %v409_v13 }
 0x513   :  { %v577_v42 = vpop.xlane.xlu1 %576 }
 0x514   :  { %v581_v43 = vsub.f32 %v570_v20, %v577_v42 }
 0x516   :  { %v583_v44 = vmul.f32 1.442695, %v581_v43 }
 0x518   :  { %1155 = vpow2.f32 %v583_v44 }
 0x51e   :  { %v1156_v45 = vpop.eup %1155 }
 0x51f   :  { %v587_v46 = vsel %vm111_vm0, %v1156_v45, 0.0 }
 0x520   :  { %v580_v17 = vpop.xlane.xlu2 %579  ;;  %588 = vadd.xlane.f32.xlu2 %v587_v46 }
 0x521   :  { %v582_v47 = vsub.f32 %v573_v29, %v580_v17 }
 0x523   :  { %v585_v48 = vmul.f32 1.442695, %v582_v47 }
 0x525   :  { %1157 = vpow2.f32 %v585_v48 }
 0x529   :  { %v731_v49 = vpop.xlane.xlu0 %730 }
 0x52a   :  { %v735_v50 = vsub.f32 %v724_v36, %v731_v49 }
 0x52b   :  { %v1158_v51 = vpop.eup %1157  ;;  %v1125_v52 = vpop.permute.xlu1 %1124 }
 0x52c   :  { %v737_v2 = vmul.f32 1.442695, %v735_v50  ;;  %v1126_v53 = vunpack.i.l.bf16 %v1125_v52  ;;  %v590_v54 = vsel %vm111_vm0, %v1158_v51, 0.0  ;;  %v1127_v56 = vunpack.i.h.bf16 %v1125_v52 }
 0x52d   :  { %591 = vadd.xlane.f32.xlu2 %v590_v54 }
 0x52e   :  { %1159 = vpow2.f32 %v737_v2  ;;  %773 = vmatpush.msrb.mxu0 %v1126_v53 }
 0x52f   :  { %v441_v19 = vpop.f32.mrf.mxu3 }
 0x530   :  { %774 = vmatpush.msrb.mxu0 %v1127_v56 }
 0x531   :  { %v734_v57 = vpop.xlane.xlu2 %733 }
 0x532   :  { %v736_v58 = vsub.f32 %v727_v39, %v734_v57  ;;  %v658_v39 = vld [vmem:[%s1604_s3 + $0x10] sm:$0xff] }
 0x533   :  { %680 = vmatpush.msra.mxu1 %v658_v39  ;;  %v1131_v39 = vld [vmem:[#allocation8 + $0x30] ss:$0 sm:$0xff] }
 0x534   :  { %v1160_v59 = vpop.eup %1159  ;;  %v739_v60 = vmul.f32 1.442695, %v736_v58 }
 0x535   :  { %1079 = vmatmul.msk.f32.vlgmr.msrb.gmra.mxu0 %vm111_vm0, %v1160_v59  ;;  %v741_v61 = vsel %vm111_vm0, %v1160_v59, 0.0 }
 0x536   :  { %1161 = vpow2.f32 %v739_v60  ;;  %742 = vadd.xlane.f32.xlu0 %v741_v61 }
 0x537   :  { %v444_v34 = vpop.f32.mrf.mxu3 }
 0x539   :  { %v408_v62 = vpop.xlane.xlu2 %407 }
 0x53a   :  { %1163 = vrcp.f32 %v408_v62  ;;  %v458_v11 = vand.u32 2147483648, %v408_v62  ;;  %v456_v14 = vand.u32 2147483647, %v408_v62  ;;  %vm452_vm5 = vweird.f32 %v408_v62 }
 0x53c   :  { %v1162_v63 = vpop.eup %1161  ;;  %v1120_v0 = vpop.permute.xlu0 %1119  ;;  %v459_v20 = vor.u32 1.1754944e-38, %v458_v11  ;;  %vm457_vm7 = vcmp.eq.f32.partialorder %v456_v14, 8.507059e+37 }
 0x53d   :  { %v1121_v1 = vunpack.i.l.bf16 %v1120_v0  ;;  %1080 = vmatmul.msk.f32.gmra.mxu0 %vm111_vm0, %v1162_v63  ;;  %v744_v3 = vsel %vm111_vm0, %v1162_v63, 0.0  ;;  %v1122_v4 = vunpack.i.h.bf16 %v1120_v0 }
 0x53e   :  { %745 = vadd.xlane.f32.xlu1 %v744_v3 }
 0x53f   :  { %619 = vmatpush.msra.mxu3 %v1121_v1 }
 0x540   :  { %v1164_v5 = vpop.eup %1163 }
 0x541   :  { %v448_v7 = vmul.f32 %v1164_v5, %v408_v62  ;;  %v411_v8 = vpop.xlane.xlu2 %410  ;;  %620 = vmatpush.msra.mxu3 %v1122_v4  ;;  %vm453_vm4 = vweird.f32 %v1164_v5 }
 0x542   :  { %1165 = vrcp.f32 %v411_v8  ;;  %1071 = vmatmul.msk.f32.vlgmr.msra.gmra.mxu3 %vm111_vm0, %v1156_v45  ;;  %vm454_vm6 = vmor %vm452_vm5, %vm453_vm4  ;;  %v472_v27 = vand.u32 2147483648, %v411_v8  ;;  %v470_v29 = vand.u32 2147483647, %v411_v8  ;;  %vm466_vm10 = vweird.f32 %v411_v8 }
 0x543   :  { %v449_v9 = vsub.f32 1.0, %v448_v7  ;;  %834 = vmatpush.msrb.mxu3 %v812_v37 }
 0x544   :  { %v473_v32 = vor.u32 1.1754944e-38, %v472_v27  ;;  %vm471_vm12 = vcmp.eq.f32.partialorder %v470_v29, 8.507059e+37 }
 0x545   :  { %v450_v12 = vmul.f32 %v1164_v5, %v449_v9 }
 0x547   :  { %v451_v15 = vadd.f32 %v1164_v5, %v450_v12 }
 0x548   :  { %v1166_v16 = vpop.eup %1165 }
 0x549   :  { %v462_v21 = vmul.f32 %v1166_v16, %v411_v8  ;;  %v455_v22 = vsel %vm454_vm6, %v1164_v5, %v451_v15  ;;  %vm467_vm8 = vweird.f32 %v1166_v16 }
 0x54a   :  { %1072 = vmatmul.msk.f32.gmra.mxu3 %vm111_vm0, %v1158_v51  ;;  %v460_v23 = vsel %vm457_vm7, %v459_v20, %v455_v22  ;;  %vm468_vm11 = vmor %vm466_vm10, %vm467_vm8 }
 0x54b   :  { %v463_v25 = vsub.f32 1.0, %v462_v21  ;;  %v475_v26 = vmul.f32 %v460_v23, %v441_v19 }
 0x54d   :  { %v464_v28 = vmul.f32 %v1166_v16, %v463_v25  ;;  %1063 = vmatmul.msk.f32.vlgmr.msrb.gmra.mxu1 %vm239_vm9, %v475_v26 }
 0x54f   :  { %v465_v31 = vadd.f32 %v1166_v16, %v464_v28 }
 0x551   :  { %v469_v33 = vsel %vm468_vm11, %v1166_v16, %v465_v31 }
 0x552   :  { %v474_v35 = vsel %vm471_vm12, %v473_v32, %v469_v33 }
 0x553   :  { %v476_v36 = vmul.f32 %v474_v35, %v444_v34 }
 0x555   :  { %1064 = vmatmul.msk.f32.gmra.mxu1 %vm239_vm9, %v476_v36 }
 0x593   :  { %v589_v38 = vpop.xlane.xlu2 %588 }
 0x594   :  { %1167 = vrcp.f32 %v589_v38  ;;  %v639_v4 = vand.u32 2147483648, %v589_v38  ;;  %vm633_vm7 = vweird.f32 %v589_v38  ;;  %v637_v7 = vand.u32 2147483647, %v589_v38 }
 0x596   :  { %v640_v16 = vor.u32 1.1754944e-38, %v639_v4  ;;  %vm638_vm11 = vcmp.eq.f32.partialorder %v637_v7, 8.507059e+37  ;;  %v938_v7 = vld [vmem:[%s1606_s5 + $0x18] sm:$0xff] }
 0x59a   :  { %v1168_v13 = vpop.eup %1167 }
 0x59b   :  { %v629_v45 = vmul.f32 %v1168_v13, %v589_v38  ;;  %vm634_vm4 = vweird.f32 %v1168_v13 }
 0x59c   :  { %vm635_vm10 = vmor %vm633_vm7, %vm634_vm4  ;;  %vm944_vm7 = vcmask 523264  }
 0x59d   :  { %v630_v49 = vsub.f32 1.0, %v629_v45 }
 0x59f   :  { %v631_v58 = vmul.f32 %v1168_v13, %v630_v49 }
 0x5a0   :  { %v1525_v41 = vpop.xlane.xlu2 %591 }
 0x5a1   :  { %v632_v1 = vadd.f32 %v1168_v13, %v631_v58  ;;  %v653_v23 = vand.u32 2147483648, %v1525_v41  ;;  %v651_v25 = vand.u32 2147483647, %v1525_v41 }
 0x5a3   :  { %v636_v12 = vsel %vm635_vm10, %v1168_v13, %v632_v1  ;;  %v654_v27 = vor.u32 1.1754944e-38, %v653_v23 }
 0x5a4   :  { %v641_v20 = vsel %vm638_vm11, %v640_v16, %v636_v12  ;;  %v1132_v16 = vld [vmem:[#allocation8 + $0x48] ss:$0 sm:$0xff] }
 0x5a9   :  { %v743_v40 = vpop.xlane.xlu0 %742 }
 0x5aa   :  { %1169 = vrcp.f32 %v743_v40  ;;  %v793_v17 = vand.u32 2147483648, %v743_v40  ;;  %v791_v48 = vand.u32 2147483647, %v743_v40  ;;  %vm787_vm14 = vweird.f32 %v743_v40 }
 0x5ab   :  { %1171 = vrcp.f32 %v1525_v41 }
 0x5ac   :  { %v794_v53 = vor.u32 1.1754944e-38, %v793_v17  ;;  %vm792_vm2 = vcmp.eq.f32.partialorder %v791_v48, 8.507059e+37 }
 0x5b0   :  { %v1170_v42 = vpop.eup %1169 }
 0x5b1   :  { %v783_v43 = vmul.f32 %v1170_v42, %v743_v40  ;;  %v746_v44 = vpop.xlane.xlu1 %745  ;;  %vm788_vm13 = vweird.f32 %v1170_v42  ;;  %v1172_v50 = vpop.eup %1171 }
 0x5b2   :  { %1173 = vrcp.f32 %v746_v44  ;;  %v776_v2 = vpop.f32.mrf.mxu0  ;;  %vm789_vm15 = vmor %vm787_vm14, %vm788_vm13  ;;  %v643_v56 = vmul.f32 %v1172_v50, %v1525_v41  ;;  %v807_v61 = vand.u32 2147483648, %v746_v44  ;;  %v805_v63 = vand.u32 2147483647, %v746_v44 }
 0x5b3   :  { %v784_v46 = vsub.f32 1.0, %v783_v43  ;;  %vm801_vm5 = vweird.f32 %v746_v44  ;;  %vm648_vm12 = vweird.f32 %v1172_v50  ;;  %vm647_vm13 = vweird.f32 %v1525_v41 }
 0x5b4   :  { %v644_v0 = vsub.f32 1.0, %v643_v56  ;;  %v808_v5 = vor.u32 1.1754944e-38, %v807_v61  ;;  %vm806_vm8 = vcmp.eq.f32.partialorder %v805_v63, 8.507059e+37  ;;  %vm649_vm14 = vmor %vm647_vm13, %vm648_vm12  ;;  %v900_v56 = vld [vmem:[%s1605_s4 + $0x8] sm:$0xff]  ;;  %v942_v61 = vld [vmem:[%s1606_s5 + $0x38] sm:$0xff] }
 0x5b5   :  { %v785_v47 = vmul.f32 %v1170_v42, %v784_v46  ;;  %959 = vmatpush.msrb.mxu2 %v942_v61  ;;  %v940_v63 = vld [vmem:[%s1606_s5 + $0x28] sm:$0xff] }
 0x5b6   :  { %v645_v14 = vmul.f32 %v1172_v50, %v644_v0 }
 0x5b7   :  { %v786_v51 = vadd.f32 %v1170_v42, %v785_v47 }
 0x5b8   :  { %v1174_v52 = vpop.eup %1173  ;;  %v646_v22 = vadd.f32 %v1172_v50, %v645_v14 }
 0x5b9   :  { %v797_v54 = vmul.f32 %v1174_v52, %v746_v44  ;;  %v790_v55 = vsel %vm789_vm15, %v1170_v42, %v786_v51  ;;  %vm802_vm3 = vweird.f32 %v1174_v52  ;;  %vm652_vm15 = vcmp.eq.f32.partialorder %v651_v25, 8.507059e+37 }
 0x5ba   :  { %v795_v57 = vsel %vm792_vm2, %v794_v53, %v790_v55  ;;  %vm803_vm6 = vmor %vm801_vm5, %vm802_vm3  ;;  %v779_v9 = vpop.f32.mrf.mxu0  ;;  %v650_v26 = vsel %vm649_vm14, %v1172_v50, %v646_v22  ;;  %v901_v55 = vld [vmem:[%s1605_s4 + $0x10] sm:$0xff] }
 0x5bb   :  { %v798_v59 = vsub.f32 1.0, %v797_v54  ;;  %v810_v60 = vmul.f32 %v795_v57, %v776_v2  ;;  %v655_v29 = vsel %vm652_vm15, %v654_v27, %v650_v26  ;;  %v902_v54 = vld [vmem:[%s1605_s4 + $0x18] sm:$0xff]  ;;  %v899_v57 = vld [vmem:[%s1605_s4] sm:$0xff]  ;;  %v1133_v22 = vld [vmem:[#allocation8 + $0x50] ss:$0 sm:$0xff] }
 0x5bc   :  { %922 = vmatpush.msrb.mxu1 %v902_v54 }
 0x5bd   :  { %v799_v62 = vmul.f32 %v1174_v52, %v798_v59  ;;  %1081 = vmatmul.msk.f32.vlgmr.msrb.gmra.mxu3 %vm239_vm9, %v810_v60 }
 0x5be   :  { %923 = vmatpush.msrb.mxu1 %v901_v55 }
 0x5bf   :  { %v800_v3 = vadd.f32 %v1174_v52, %v799_v62  ;;  %v941_v62 = vld [vmem:[%s1606_s5 + $0x30] sm:$0xff] }
 0x5c0   :  { %924 = vmatpush.msrb.mxu1 %v900_v56  ;;  %960 = vmatpush.msrb.mxu2 %v941_v62 }
 0x5c1   :  { %v804_v8 = vsel %vm803_vm6, %v1174_v52, %v800_v3  ;;  %v939_v3 = vld [vmem:[%s1606_s5 + $0x20] sm:$0xff] }
 0x5c2   :  { %v809_v11 = vsel %vm806_vm8, %v808_v5, %v804_v8  ;;  %925 = vmatpush.msrb.mxu1 %v899_v57  ;;  %961 = vmatpush.msrb.mxu2 %v940_v63 }
 0x5c3   :  { %v811_v15 = vmul.f32 %v809_v11, %v779_v9 }
 0x5c4   :  { %962 = vmatpush.msrb.mxu2 %v939_v3 }
 0x5c5   :  { %v622_v19 = vpop.f32.mrf.mxu3  ;;  %1082 = vmatmul.msk.f32.gmra.mxu3 %vm239_vm9, %v811_v15 }
 0x5c6   :  { %v656_v21 = vmul.f32 %v641_v20, %v622_v19  ;;  %963 = vmatpush.msrb.mxu2 %v938_v7 }
 0x5c8   :  { %1073 = vmatmul.msk.f32.vlgmr.msra.gmra.mxu1 %vm239_vm9, %v656_v21 }
 0x5ca   :  { %v501_v32 = vpop.f32.mrf.mxu1 }
 0x5cb   :  { %v531_v34 = vadd.f32 %v1490_v24, %v501_v32 }
 0x5cd   :  { %v625_v28 = vpop.f32.mrf.mxu3 }
 0x5ce   :  { %v657_v31 = vmul.f32 %v655_v29, %v625_v28 }
 0x5d0   :  { %1074 = vmatmul.msk.f32.gmra.mxu1 %vm239_vm9, %v657_v31 }
 0x5d2   :  { %v504_v33 = vpop.f32.mrf.mxu1 }
 0x5d3   :  { %v534_v41 = vadd.f32 %v1493_v30, %v504_v33 }
 0x640   :  { %v836_v35 = vpop.f32.mrf.mxu3 }
 0x645   :  { %v682_v36 = vpop.f32.mrf.mxu1 }
 0x646   :  { %v688_v37 = vadd.f32 %v682_v36, %v531_v34  ;;  %v937_v34 = vld [vmem:[%s1606_s5 + $0x10] sm:$0xff]  ;;  %v935_v36 = vld [vmem:[%s1606_s5] sm:$0xff] }
 0x647   :  { %964 = vmatpush.msrb.mxu2 %v937_v34 }
 0x648   :  { %v842_v38 = vadd.f32 %v836_v35, %v688_v37  ;;  %v839_v45 = vpop.f32.mrf.mxu3  ;;  %v936_v35 = vld [vmem:[%s1606_s5 + $0x8] sm:$0xff]  ;;  %v1134_v37 = vld [vmem:[#allocation8 + $0x58] ss:$0 sm:$0xff]  ;;  %s1325_s5 = smov [#allocation10]  }
 0x649   :  { %965 = vmatpush.msrb.mxu2 %v936_v35  ;;  %s1033_s21 = sshll.u32 %s1325_s5, 4  ;;  %s1034_s21 = int_to_ptr.vmem [resolvable:$true] %s1033_s21 }
 0x64a   :  { %v844_v40 = vadd.f32 %v842_v38, %v1385_v6 }
 0x64b   :  { %966 = vmatpush.msrb.mxu2 %v935_v36 }
 0x64c   :  { %v1539_v13 = vadd.f32 %v1131_v39, %v844_v40 }
 0x64d   :  { %v685_v42 = vpop.f32.mrf.mxu1 }
 0x64e   :  { %v689_v43 = vadd.f32 %v685_v42, %v534_v41  ;;  %v849_v44 = vsel %vm141_vm1, %v1539_v13, 0.0 }
 0x64f   :  { %850 = vadd.xlane.f32.xlu2 %v849_v44  ;;  %v1002_v44 = vld [vmem:[#allocation7 + $0x18] sm:$0xff] }
 0x650   :  { %v843_v46 = vadd.f32 %v839_v45, %v689_v43  ;;  %v1001_v45 = vld [vmem:[#allocation7 + $0x10] sm:$0xff]  ;;  %1019 = vmatpush.msra.mxu3 %v1002_v44 }
 0x652   :  { %v845_v24 = vadd.f32 %v843_v46, %v1389_v10  ;;  %v1000_v46 = vld [vmem:[#allocation7 + $0x8] sm:$0xff]  ;;  %1020 = vmatpush.msra.mxu3 %v1001_v45 }
 0x654   :  { %v1544_v17 = vadd.f32 %v1131_v39, %v845_v24  ;;  %v999_v24 = vld [vmem:[#allocation7] sm:$0xff]  ;;  %1021 = vmatpush.msra.mxu3 %v1000_v46 }
 0x656   :  { %v852_v47 = vsel %vm141_vm1, %v1544_v17, 0.0  ;;  %1022 = vmatpush.msra.mxu3 %v999_v24 }
 0x657   :  { %853 = vadd.xlane.f32.xlu2 %v852_v47 }
 0x6c2   :  { %v851_v6 = vpop.xlane.xlu2 %850 }
 0x6c3   :  { %v855_v30 = vmul.f32 %v851_v6, %v1393_v18  ;;  %v1135_v6 = vld [vmem:[#allocation8 + $0x60] ss:$0 sm:$0xff] }
 0x6c5   :  { %v857_v48 = vsub.f32 %v1539_v13, %v855_v30 }
 0x6c7   :  { %v859_v49 = vmul.f32 %v857_v48, %v857_v48 }
 0x6c9   :  { %v861_v50 = vsel %vm141_vm1, %v859_v49, 0.0 }
 0x6ca   :  { %862 = vadd.xlane.f32.xlu2 %v861_v50  ;;  %v854_v51 = vpop.xlane.xlu2 %853 }
 0x6cb   :  { %v856_v52 = vmul.f32 %v854_v51, %v1393_v18 }
 0x6cd   :  { %v858_v10 = vsub.f32 %v1544_v17, %v856_v52  ;;  %v97_v52 = vld [vmem:[#allocation8 + $0x20] sm:$0xff] }
 0x6cf   :  { %v860_v2 = vmul.f32 %v858_v10, %v858_v10 }
 0x6d1   :  { %v864_v53 = vsel %vm141_vm1, %v860_v2, 0.0  ;;  %v1136_v2 = vld [vmem:[#allocation8 + $0x68] ss:$0 sm:$0xff] }
 0x6d2   :  { %865 = vadd.xlane.f32.xlu0 %v864_v53 }
 0x73d   :  { %v863_v58 = vpop.xlane.xlu2 %862 }
 0x73e   :  { %v867_v59 = vmul.f32 %v863_v58, %v1393_v18 }
 0x740   :  { %v869_v60 = vadd.f32 1e-06, %v867_v59 }
 0x742   :  { %1175 = vrsqrt.f32 %v869_v60  ;;  %vm877_vm2 = vweird.f32 %v869_v60 }
 0x745   :  { %v866_v0 = vpop.xlane.xlu0 %865 }
 0x746   :  { %v868_v1 = vmul.f32 %v866_v0, %v1393_v18 }
 0x748   :  { %v1176_v4 = vpop.eup %1175  ;;  %v870_v5 = vadd.f32 1e-06, %v868_v1 }
 0x749   :  { %v872_v8 = vmul.f32 %v1176_v4, %v869_v60  ;;  %vm878_vm9 = vweird.f32 %v1176_v4 }
 0x74a   :  { %1177 = vrsqrt.f32 %v870_v5  ;;  %vm879_vm3 = vmor %vm877_vm2, %vm878_vm9  ;;  %vm887_vm5 = vweird.f32 %v870_v5 }
 0x74b   :  { %v873_v9 = vmul.f32 %v1176_v4, %v872_v8 }
 0x74d   :  { %v874_v11 = vmul.f32 0.5, %v873_v9 }
 0x74f   :  { %v875_v12 = vsub.f32 1.5, %v874_v11 }
 0x750   :  { %v1178_v18 = vpop.eup %1177 }
 0x751   :  { %v876_v14 = vmul.f32 %v1176_v4, %v875_v12  ;;  %v882_v15 = vmul.f32 %v1178_v18, %v870_v5  ;;  %vm888_vm4 = vweird.f32 %v1178_v18 }
 0x752   :  { %vm889_vm6 = vmor %vm887_vm5, %vm888_vm4 }
 0x753   :  { %v880_v19 = vsel %vm879_vm3, %v1176_v4, %v876_v14  ;;  %v883_v20 = vmul.f32 %v1178_v18, %v882_v15 }
 0x754   :  { %v891_v21 = vmul.f32 %v880_v19, %v857_v48 }
 0x755   :  { %v884_v23 = vmul.f32 0.5, %v883_v20 }
 0x756   :  { %v894_v25 = vmul.f32 %v1132_v16, %v891_v21 }
 0x757   :  { %v885_v26 = vsub.f32 1.5, %v884_v23 }
 0x758   :  { %v897_v27 = vadd.f32 %v1133_v22, %v894_v25 }
 0x759   :  { %v886_v28 = vmul.f32 %v1178_v18, %v885_v26 }
 0x75a   :  { %1083 = vmatmul.msk.f32.vlgmr.msrb.gmra.mxu1 %vm141_vm1, %v897_v27 }
 0x75b   :  { %v890_v29 = vsel %vm889_vm6, %v1178_v18, %v886_v28 }
 0x75c   :  { %v892_v31 = vmul.f32 %v890_v29, %v858_v10 }
 0x75e   :  { %v895_v32 = vmul.f32 %v1132_v16, %v892_v31 }
 0x760   :  { %v898_v33 = vadd.f32 %v1133_v22, %v895_v32 }
 0x762   :  { %1084 = vmatmul.msk.f32.gmra.mxu1 %vm141_vm1, %v898_v33 }
 0x7d7   :  { %v927_v38 = vpop.f32.mrf.mxu1 }
 0x7d8   :  { %v928_v39 = vadd.f32 %v1134_v37, %v927_v38 }
 0x7da   :  { %v933_v40 = vmax.f32 %v928_v39, 0.0 }
 0x7dc   :  { %1085 = vmatmul.msk.f32.vlgmr.msrb.gmra.mxu2 %vm944_vm7, %v933_v40 }
 0x7df   :  { %v930_v41 = vpop.f32.mrf.mxu1 }
 0x7e0   :  { %v931_v42 = vadd.f32 %v1134_v37, %v930_v41 }
 0x7e2   :  { %v934_v43 = vmax.f32 %v931_v42, 0.0 }
 0x7e4   :  { %1086 = vmatmul.msk.f32.gmra.mxu2 %vm944_vm7, %v934_v43 }
 0x85f   :  { %v968_v47 = vpop.f32.mrf.mxu2 }
 0x860   :  { %v969_v48 = vadd.f32 %v1135_v6, %v968_v47 }
 0x862   :  { %v974_v51 = vadd.f32 %v969_v48, %v1539_v13 }
 0x867   :  { %v971_v30 = vpop.f32.mrf.mxu2 }
 0x868   :  { %v972_v49 = vadd.f32 %v1135_v6, %v971_v30 }
 0x86a   :  { %v975_v50 = vadd.f32 %v972_v49, %v1544_v17 }
 0x86c   :  { %993 = vmatpush.msra.mxu0 %v975_v50 }
 0x86e   :  { %994 = vmatpush.msra.mxu0 %v974_v51 }
 0x86f   :  { %1087 = vmatmul.msk.f32.vlgmr.msra.gmra.mxu0 %vm111_vm0, %v97_v52 }
 0x8ec   :  { %v996_v10 = vpop.f32.mrf.mxu0 }
 0x8ed   :  { %1088 = vmatmul.msk.f32.vlgmr.msra.gmra.mxu3 %vm141_vm1, %v996_v10 }
 0x970   :  { %v1024_v53 = vpop.f32.mrf.mxu3 }
 0x971   :  { %v1025_v54 = vadd.f32 %v1136_v2, %v1024_v53 }
 0x973   :  { %1027 = vst [vmem:[#allocation10] sm:$0xff] %v1025_v54 }
 0x974   :  { %1038 = dma.vmem_to_hbm [thread:$0]  %s1034_s21, 128, %s1036_s0, [#allocation4]  }
 0x975   :  { %1305 = dma.done.wait [#allocation4], 128  }
 0x976   :  { %1306 = vsyncadd [#allocation4], 4294967168 }
 0x977   :  { %1043 = vsyncpa [#allocation3], 1 }
 0x978   :  { %1044 = vsyncpa [#allocation6], 1 }
 0x979   :  { %1045 = vsyncpa [#allocation9], 1 }
 0x97a   :  { %1046 = vsyncpa [#allocation4], 1 }

</bundles_post_ra>
